<compile_context>
chip_gen: v6e
topology: v6e:2x2x1
jax: 0.10.0
libtpu: 0.0.40
codegen_flags: <defaults>
</compile_context>

<pallas_src>
import functools

import jax
import jax.numpy as jnp
from jax import lax
from jax.experimental import pallas as pl
from jax.experimental.pallas import tpu as pltpu

LANES = 128
BLOCK_BYTES = 4 << 20      # HBM bytes streamed per input per grid step
CHUNK_ROWS = 128           # rows per in-kernel sub-chunk (16 f32 vregs)


def _cdiv(a, b):
    return -(-a // b)


def _round_up(n, m):
    return _cdiv(n, m) * m


def _charbonnier_block_kernel(x_ref, y_ref, o_ref, *, eps, block_rows,
                              chunk_rows, num_chunks, rows_total, ragged,
                              unroll):
    """One grid step: partial Charbonnier sum -> (8, LANES) per-lane partials."""
    lanes = o_ref.shape[-1]

    if ragged:
        # Rows >= `limit` in this block lie beyond the input array (the last
        # block overruns it); their VMEM contents are undefined -> zero them.
        limit = rows_total - pl.program_id(0) * block_rows       # int32 scalar
        row_iota = lax.broadcasted_iota(jnp.int32, (chunk_rows, lanes), 0)

    def chunk(c, acc):
        r0 = pl.multiple_of(c * chunk_rows, chunk_rows)
        xd = x_ref[pl.ds(r0, chunk_rows), :].astype(jnp.float32)
        yd = y_ref[pl.ds(r0, chunk_rows), :].astype(jnp.float32)
        d = xd - yd
        v = jnp.sqrt(d * d + eps)                 # eps is a Python float
        if ragged:
            v = jnp.where(row_iota < (limit - c * chunk_rows), v, 0.0)
        # Fold (chunk_rows, 128) -> (8, 128): cross-vreg VALU adds only; the
        # reshape stays on (8, 128) tile boundaries (no relayout).
        return acc + v.reshape(chunk_rows // 8, 8, lanes).sum(axis=0)

    acc = lax.fori_loop(0, num_chunks, chunk,
                        jnp.zeros((8, lanes), jnp.float32), unroll=unroll)
    o_ref[0] = acc


def _block_sizing(rows, itemsize):
    """Pick (num_blocks, block_rows, chunk_rows) for a (rows, 128) slab."""
    pack = max(8, 32 // itemsize)                  # f32: 8, bf16: 16, int8: 32
    max_rows = max(pack, (BLOCK_BYTES // (LANES * itemsize)) // pack * pack)
    block_rows = _round_up(rows, pack) if rows <= max_rows else max_rows
    chunk_rows = min(CHUNK_ROWS, block_rows)       # CHUNK_ROWS % 32 == 0
    block_rows = _round_up(block_rows, chunk_rows)
    num_blocks = _cdiv(rows, block_rows)
    return num_blocks, block_rows, chunk_rows


def charbonnier_loss(x, y, eps=1e-6, reduction="sum"):
    """Pallas TPU Charbonnier loss: sum/mean(sqrt((x - y)^2 + eps))."""
    assert x.shape == y.shape, (x.shape, y.shape)
    if reduction not in ("sum", "mean"):
        raise TypeError("Unknown reduction type")

    eps = float(eps)
    total = x.size
    if total == 0:
        return jnp.float32(0.0) if reduction == "sum" else jnp.float32(float("nan"))

    xf = x.reshape(-1)
    yf = y.reshape(-1)

    tail = total % LANES          # sub-lane remainder (< 128 elements)
    main = total - tail

    s = jnp.float32(0.0)
    if tail:
        # Tiny ragged tail (<=127 elems): plain jnp, negligible traffic.
        dt = xf[main:].astype(jnp.float32) - yf[main:].astype(jnp.float32)
        s = s + jnp.sum(jnp.sqrt(dt * dt + eps))

    if main:
        # Prefix slice only happens when total % 128 != 0 (may cost one copy);
        # the common lane-aligned case is fully copy-free.
        xm = xf[:main] if tail else xf
        ym = yf[:main] if tail else yf

        rows = main // LANES
        itemsize = max(x.dtype.itemsize, y.dtype.itemsize)
        num_blocks, block_rows, chunk_rows = _block_sizing(rows, itemsize)
        num_chunks = block_rows // chunk_rows
        ragged = num_blocks * block_rows != rows   # only the last block is ragged

        xm = xm.reshape(rows, LANES)
        ym = ym.reshape(rows, LANES)

        kernel = functools.partial(
            _charbonnier_block_kernel, eps=eps, block_rows=block_rows,
            chunk_rows=chunk_rows, num_chunks=num_chunks, rows_total=rows,
            ragged=ragged, unroll=(num_chunks <= 8))

        # Double-buffered inputs + margin; well under v7x's 64 MiB physical VMEM.
        in_block_bytes = block_rows * LANES * (x.dtype.itemsize + y.dtype.itemsize)
        vmem_limit = int(min(max(2 * in_block_bytes + (4 << 20), 32 << 20), 48 << 20))

        cost = pl.CostEstimate(
            flops=4 * main,
            transcendentals=main,
            bytes_accessed=main * (x.dtype.itemsize + y.dtype.itemsize)
            + num_blocks * 8 * LANES * 4,
        )

        partials = pl.pallas_call(
            kernel,
            out_shape=jax.ShapeDtypeStruct((num_blocks, 8, LANES), jnp.float32),
            grid_spec=pltpu.PrefetchScalarGridSpec(
                num_scalar_prefetch=0,
                grid=(num_blocks,),
                in_specs=[
                    pl.BlockSpec((block_rows, LANES), lambda i: (i, 0)),
                    pl.BlockSpec((block_rows, LANES), lambda i: (i, 0)),
                ],
                out_specs=pl.BlockSpec((1, 8, LANES), lambda i: (i, 0, 0)),
            ),
            compiler_params=pltpu.CompilerParams(
                # Independent per-block partials (no carried accumulator) ->
                # megacore-safe; switch to pltpu.CORE_PARALLEL if xprof shows
                # only one TensorCore busy on v7x.
                dimension_semantics=("parallel",),
                vmem_limit_bytes=vmem_limit,
            ),
            cost_estimate=cost,
        )(xm, ym)

        s = s + jnp.sum(partials)

    if reduction == "mean":
        # Host-double reciprocal: one f32 rounding, exact for huge `total`.
        s = s * jnp.float32(1.0 / total)
    return s


def charbonnier_loss_ref(x, y, eps=1e-6, reduction="sum"):
    diff = x.astype(jnp.float32) - y.astype(jnp.float32)
    v = jnp.sqrt(diff * diff + eps)
    return jnp.sum(v) if reduction == "sum" else jnp.mean(v)


if __name__ == "__main__":
    key = jax.random.PRNGKey(0)

    checks = [
        (2, 4, 16, 16),     # lane/sublane aligned: fully copy-free single-chunk path
        (2, 4, 40, 64),     # aligned rows, ragged block -> in-kernel mask, unrolled chunks
        (2, 4, 128, 144),   # aligned, 9-chunk non-unrolled fori_loop path
        (3, 3, 11, 13),     # odd size: <128-elem jnp tail + masked ragged block
        (2, 4, 368, 368),   # multi-block grid (2 blocks) + masked last block
    ]
    for i, shape in enumerate(checks):
        k1, k2 = jax.random.split(jax.random.fold_in(key, i))
        x = jax.random.normal(k1, shape, dtype=jnp.float32)
        y = jax.random.normal(k2, shape, dtype=jnp.float32)
        for reduction in ("sum", "mean"):
            out = jax.block_until_ready(charbonnier_loss(x, y, reduction=reduction))
            ref = charbonnier_loss_ref(x, y, reduction=reduction)
            assert jnp.allclose(out, ref, rtol=2e-5, atol=1e-4), (
                shape, reduction, out, ref)

    print("KERNEL_OK")
</pallas_src>

<mosaic_0001>
module attributes {stable_mosaic.version = 11 : i64} {
  func.func @_charbonnier_block_kernel(%arg0: i32, %arg1: memref<16x128xf32, #tpu.memory_space<vmem>>, %arg2: memref<16x128xf32, #tpu.memory_space<vmem>>, %arg3: memref<1x8x128xf32, #tpu.memory_space<vmem>>) attributes {dimension_semantics = [#tpu.dimension_semantics<parallel>], iteration_bounds = array<i64: 1>, scalar_prefetch = 0 : i64, scratch_operands = 0 : i64, tpu.core_type = #tpu.core_type<tc>, window_params = [{transform_indices = @transform_0, window_bounds = array<i64: 16, 128>}, {transform_indices = @transform_1, window_bounds = array<i64: 16, 128>}, {transform_indices = @transform_2, window_bounds = array<i64: 1, 8, 128>}]} {
    %cst = arith.constant 0.000000e+00 : f32
    %0 = vector.broadcast %cst : f32 to vector<8x128xf32>
    %c0_i32 = arith.constant 0 : i32
    %c16_i32 = arith.constant 16 : i32
    %1 = arith.muli %c0_i32, %c16_i32 : i32
    %2 = tpu.assume_multiple %1, 16 : i32
    %3 = arith.index_cast %2 : i32 to index
    %c0 = arith.constant 0 : index
    %4 = vector.load %arg1[%3, %c0] : memref<16x128xf32, #tpu.memory_space<vmem>>, vector<16x128xf32>
    %5 = arith.index_cast %2 : i32 to index
    %c0_0 = arith.constant 0 : index
    %6 = vector.load %arg2[%5, %c0_0] : memref<16x128xf32, #tpu.memory_space<vmem>>, vector<16x128xf32>
    %7 = arith.subf %4, %6 : vector<16x128xf32>
    %8 = arith.mulf %7, %7 : vector<16x128xf32>
    %cst_1 = arith.constant 9.99999997E-7 : f32
    %9 = vector.broadcast %cst_1 : f32 to vector<16x128xf32>
    %10 = arith.addf %8, %9 : vector<16x128xf32>
    %11 = math.sqrt %10 : vector<16x128xf32>
    %12 = vector.shape_cast %11 : vector<16x128xf32> to vector<2x8x128xf32>
    %cst_2 = arith.constant dense<0.000000e+00> : vector<8x128xf32>
    %13 = vector.multi_reduction <add>, %12, %cst_2 [0] : vector<2x8x128xf32> to vector<8x128xf32>
    %14 = arith.addf %0, %13 : vector<8x128xf32>
    %c1_i32 = arith.constant 1 : i32
    %c0_3 = arith.constant 0 : index
    %c0_4 = arith.constant 0 : index
    %c0_5 = arith.constant 0 : index
    %15 = vector.load %arg3[%c0_3, %c0_4, %c0_5] : memref<1x8x128xf32, #tpu.memory_space<vmem>>, vector<1x8x128xf32>
    %16 = vector.shape_cast %15 : vector<1x8x128xf32> to vector<8x128xf32>
    %17 = vector.shape_cast %14 : vector<8x128xf32> to vector<1x8x128xf32>
    tpu.vector_store %arg3[%c0_3, %c0_4, %c0_5], %17 {strides = array<i32>} : memref<1x8x128xf32, #tpu.memory_space<vmem>>, vector<1x8x128xf32>,
    return
  }
  func.func @transform_0(%arg0: i32) -> (i32, i32) {
    %c0_i32 = arith.constant 0 : i32
    %c0_i32_0 = arith.constant 0 : i32
    return %arg0, %c0_i32 : i32, i32
  }
  func.func @transform_1(%arg0: i32) -> (i32, i32) {
    %c0_i32 = arith.constant 0 : i32
    %c0_i32_0 = arith.constant 0 : i32
    return %arg0, %c0_i32 : i32, i32
  }
  func.func @transform_2(%arg0: i32) -> (i32, i32, i32) {
    %c0_i32 = arith.constant 0 : i32
    %c0_i32_0 = arith.constant 0 : i32
    %c0_i32_1 = arith.constant 0 : i32
    return %arg0, %c0_i32, %c0_i32_0 : i32, i32, i32
  }
}

</mosaic_0001>

<bundles_post_ra>
// kernel: tpu_custom_call.1
= control target key start
LH: loop header
LB: loop body
LE: loop exit
PB: predicated region body
PF: predicated region fallthrough
CT: control target
= control target key end

     0   :  { %7 = vsyncpa [#allocation3], 0  ;;  %s187_s0 = inlined_call_operand.hbm [shape: f32[16,128], index: 0, kind: input, shape index: {}]   ;;  %s188_s1 = inlined_call_operand.hbm [shape: f32[16,128], index: 1, kind: input, shape index: {}]   ;;  %s189_s2 = inlined_call_operand.hbm [shape: f32[1,8,128], index: 2, kind: output, shape index: {}]  }
   0x1   :  { %8 = vsyncpa [#allocation6], 0 }
   0x2   :  { %9 = vsyncpa [#allocation4], 0  ;;  %s158_s9 = smov [#allocation2]  }
   0x3   :  { %s15_s10 = sshll.u32 %s158_s9, 4  ;;  %s16_s10 = int_to_ptr.vmem [resolvable:$true] %s15_s10 }
   0x4   :  { %s100_s11 = scalar_lea.vmem %s16_s10, 256  ;;  %p105_p1 = scmp.lt.s32.totalorder %s16_s10, %s16_s10 }
   0x5   :  { %p101_p0 = scmp.ne.s32.totalorder %s16_s10, %s100_s11  ;;  %p106_p2 = scmp.lt.s32.totalorder %s100_s11, %s100_s11 }
   0x7   :  { %p107_p3 = por %p106_p2, %p105_p1 }
   0x9   :  { %p108_p4 = pnand %p107_p3, %p101_p0 }
   0xb   :  { %111 = shalt.err (!%p108_p4)
}
   0xc   :  { %s159_s12 = smov 128   ;;  %s160_s13 = smov 8  }
   0xd   :  { %21 = dma.hbm_to_vmem [thread:$0]  %s187_s0, 256, %s16_s10, [#allocation3], %s159_s12, %s159_s12, %s160_s13  }
   0xe   :  { %s161_s16 = smov [#allocation5]  }
   0xf   :  { %s27_s17 = sshll.u32 %s161_s16, 4  ;;  %s28_s17 = int_to_ptr.vmem [resolvable:$true] %s27_s17 }
  0x10   :  { %s120_s18 = scalar_lea.vmem %s28_s17, 256  ;;  %p125_p6 = scmp.lt.s32.totalorder %s28_s17, %s28_s17 }
  0x11   :  { %p121_p5 = scmp.ne.s32.totalorder %s28_s17, %s120_s18  ;;  %p126_p7 = scmp.lt.s32.totalorder %s120_s18, %s120_s18 }
  0x13   :  { %p127_p8 = por %p126_p7, %p125_p6 }
  0x15   :  { %p128_p9 = pnand %p127_p8, %p121_p5 }
  0x17   :  { %131 = shalt.err (!%p128_p9)
}
  0x18   :  { %33 = dma.hbm_to_vmem [thread:$0]  %s188_s1, 256, %s28_s17, [#allocation6], %s159_s12, %s159_s12, %s160_s13  }
  0x19   :  { %152 = dma.done.wait [#allocation3], 256  }
  0x1a   :  { %153 = vsyncadd [#allocation3], 4294967040 }
  0x1b   :  { %154 = dma.done.wait [#allocation6], 256  }
  0x1c   :  { %155 = vsyncadd [#allocation6], 4294967040  ;;  %v40_v0 = vld [vmem:[#allocation2] sm:$0xff]  ;;  %v41_v1 = vld [vmem:[#allocation2 + $0x8] sm:$0xff]  ;;  %s162_s0 = smov [#allocation7]  }
  0x1d   :  { %v42_v2 = vld [vmem:[#allocation5] sm:$0xff]  ;;  %v43_v3 = vld [vmem:[#allocation5 + $0x8] sm:$0xff]  ;;  %s73_s1 = sshll.u32 %s162_s0, 4  ;;  %s74_s1 = int_to_ptr.vmem [resolvable:$true] %s73_s1 }
  0x1e   :  { %v44_v4 = vsub.f32 %v40_v0, %v42_v2  ;;  %v45_v5 = vsub.f32 %v41_v1, %v43_v3  ;;  %s132_s21 = scalar_lea.vmem %s74_s1, 128  ;;  %p137_p11 = scmp.lt.s32.totalorder %s74_s1, %s74_s1 }
  0x1f   :  { %p133_p10 = scmp.ne.s32.totalorder %s74_s1, %s132_s21  ;;  %p138_p12 = scmp.lt.s32.totalorder %s132_s21, %s132_s21 }
  0x20   :  { %v46_v6 = vmul.f32 %v44_v4, %v44_v4  ;;  %v47_v7 = vmul.f32 %v45_v5, %v45_v5 }
  0x21   :  { %p139_p13 = por %p138_p12, %p137_p11 }
  0x22   :  { %v48_v8 = vadd.f32 1e-06, %v46_v6  ;;  %v49_v9 = vadd.f32 1e-06, %v47_v7 }
  0x23   :  { %p140_p0 = pnand %p139_p13, %p133_p10 }
  0x24   :  { %88 = vrsqrt.f32 %v48_v8  ;;  %vm52_vm0 = vcmp.eq.f32.partialorder %v48_v8, inf  ;;  %v55_v11 = vand.u32 2147483648, %v48_v8  ;;  %vm54_vm1 = vcmp.eq.f32.partialorder %v48_v8, 0.0 }
  0x25   :  { %90 = vrsqrt.f32 %v49_v9  ;;  %vm59_vm2 = vcmp.eq.f32.partialorder %v49_v9, inf  ;;  %v62_v14 = vand.u32 2147483648, %v49_v9  ;;  %vm61_vm3 = vcmp.eq.f32.partialorder %v49_v9, 0.0 }
  0x31   :  { %v89_v10 = vpop.eup %88 }
  0x32   :  { %v91_v12 = vpop.eup %90  ;;  %v51_v13 = vmul.f32 %v89_v10, %v48_v8 }
  0x33   :  { %v58_v15 = vmul.f32 %v91_v12, %v49_v9 }
  0x34   :  { %v53_v16 = vsel %vm52_vm0, %v48_v8, %v51_v13 }
  0x35   :  { %v56_v17 = vsel %vm54_vm1, %v55_v11, %v53_v16  ;;  %v60_v18 = vsel %vm59_vm2, %v49_v9, %v58_v15 }
  0x36   :  { %v63_v19 = vsel %vm61_vm3, %v62_v14, %v60_v18 }
  0x37   :  { %v64_v20 = vadd.f32 %v63_v19, %v56_v17 }
  0x39   :  { %66 = vst [vmem:[#allocation7] sm:$0xff] %v64_v20 }
  0x3a   :  { %143 = shalt.err (!%p140_p0)
}
  0x3b   :  { %76 = dma.vmem_to_hbm [thread:$0]  %s74_s1, 128, %s189_s2, [#allocation4]  }
  0x3c   :  { %156 = dma.done.wait [#allocation4], 128  }
  0x3d   :  { %157 = vsyncadd [#allocation4], 4294967168 }
  0x3e   :  { %80 = vsyncpa [#allocation3], 1 }
  0x3f   :  { %81 = vsyncpa [#allocation6], 1 }
  0x40   :  { %82 = vsyncpa [#allocation4], 1 }

</bundles_post_ra>
